<compile_context>
chip_gen: v7x
topology: tpu7x:2x2x1
jax: 0.10.0
libtpu: 0.0.40
codegen_flags: <defaults>
</compile_context>

<pallas_src>
import jax
import jax.numpy as jnp
from jax.experimental import pallas as pl
from jax.experimental.pallas import tpu as pltpu


def _round_up(v, m):
    return ((v + m - 1) // m) * m


def _vmem_limit(estimate_bytes):
    # 1.5x headroom over the static estimate, 32 MiB floor.  Default tiles stay
    # well inside v7x's 64 MiB physical VMEM; the cap only matters for huge N.
    return int(min(max(32 << 20, 1.5 * estimate_bytes), 112 << 20))


# --------------------------------------------------------------------------
# Stage A: XW1 = X @ W1   (row-tiled, nfeat-reduction-tiled; hoisted out of
# the adj reduction loop so it is computed exactly once)
# --------------------------------------------------------------------------
def _xw_kernel(x_ref, w_ref, out_ref, acc_ref):
    k = pl.program_id(1)

    @pl.when(k == 0)
    def _():
        acc_ref[...] = jnp.zeros_like(acc_ref)

    acc_ref[...] += jnp.dot(x_ref[...], w_ref[...],
                            preferred_element_type=jnp.float32)

    @pl.when(k == pl.num_programs(1) - 1)
    def _():
        out_ref[...] = acc_ref[...].astype(out_ref.dtype)


def _feature_transform(x, w, out_dtype, tm, tk):
    n, f_in = x.shape
    f_out = w.shape[1]
    o_isz = jnp.dtype(out_dtype).itemsize
    est = (2 * tm * tk * x.dtype.itemsize
           + 2 * tk * f_out * w.dtype.itemsize
           + tm * f_out * 4
           + 2 * tm * f_out * o_isz)
    return pl.pallas_call(
        _xw_kernel,
        out_shape=jax.ShapeDtypeStruct((n, f_out), out_dtype),
        grid=(n // tm, f_in // tk),
        in_specs=[
            pl.BlockSpec((tm, tk), lambda i, k: (i, k)),
            pl.BlockSpec((tk, f_out), lambda i, k: (k, 0)),
        ],
        out_specs=pl.BlockSpec((tm, f_out), lambda i, k: (i, 0)),
        scratch_shapes=[pltpu.VMEM((tm, f_out), jnp.float32)],
        compiler_params=pltpu.CompilerParams(
            dimension_semantics=("parallel", "arbitrary"),
            vmem_limit_bytes=_vmem_limit(est)),
        cost_estimate=pl.CostEstimate(
            flops=2 * n * f_in * f_out,
            transcendentals=0,
            bytes_accessed=(n * f_in * x.dtype.itemsize
                            + f_in * f_out * w.dtype.itemsize
                            + n * f_out * o_isz)),
    )(x, w)


# --------------------------------------------------------------------------
# Stage B1: HW2 = relu(adj @ XW1 + b1) @ W2
#   grid = (row tiles, reduction tiles over adj columns)
#   adj is streamed; XW1 / b1 / W2 are VMEM-resident (constant index_map)
# --------------------------------------------------------------------------
def _agg1_kernel(adj_ref, xw_ref, b_ref, w2_ref, out_ref, acc_ref):
    k = pl.program_id(1)
    tk = adj_ref.shape[1]

    @pl.when(k == 0)
    def _():
        acc_ref[...] = jnp.zeros_like(acc_ref)

    # XW1 is fetched once and kept VMEM-resident; slice the current reduction
    # chunk in-kernel instead of re-streaming it from HBM every k step.
    start = pl.multiple_of(k * tk, tk)
    xw_k = xw_ref[pl.ds(start, tk), :]
    acc_ref[...] += jnp.dot(adj_ref[...], xw_k,
                            preferred_element_type=jnp.float32)

    @pl.when(k == pl.num_programs(1) - 1)
    def _():
        h = jnp.maximum(acc_ref[...] + b_ref[...].astype(jnp.float32), 0.0)
        # TODO(synk): training-mode dropout would go here (pltpu.prng_seed +
        # pltpu.prng_random_bits); eval mode (training=False) is identity.
        out_ref[...] = jnp.dot(h.astype(w2_ref.dtype), w2_ref[...],
                               preferred_element_type=jnp.float32
                               ).astype(out_ref.dtype)


def _aggregate1(adj, xw, b, w2, out_dtype, tm, tk):
    n = adj.shape[0]
    f_mid = xw.shape[1]
    f_out = w2.shape[1]
    o_isz = jnp.dtype(out_dtype).itemsize
    est = (2 * tm * tk * adj.dtype.itemsize      # streamed adj (double buffered)
           + 2 * n * f_mid * xw.dtype.itemsize   # resident XW1 (budget 2x)
           + 2 * f_mid * f_out * w2.dtype.itemsize
           + tm * f_mid * 4                      # f32 accumulator
           + 2 * tm * f_out * o_isz)
    return pl.pallas_call(
        _agg1_kernel,
        out_shape=jax.ShapeDtypeStruct((n, f_out), out_dtype),
        grid=(n // tm, n // tk),
        in_specs=[
            pl.BlockSpec((tm, tk), lambda i, k: (i, k)),        # adj tile (streamed)
            pl.BlockSpec((n, f_mid), lambda i, k: (0, 0)),      # XW1 (VMEM resident)
            pl.BlockSpec((1, f_mid), lambda i, k: (0, 0)),      # b1 (tiny, resident)
            pl.BlockSpec((f_mid, f_out), lambda i, k: (0, 0)),  # W2 (tiny, resident)
        ],
        out_specs=pl.BlockSpec((tm, f_out), lambda i, k: (i, 0)),
        scratch_shapes=[pltpu.VMEM((tm, f_mid), jnp.float32)],
        compiler_params=pltpu.CompilerParams(
            dimension_semantics=("parallel", "arbitrary"),
            vmem_limit_bytes=_vmem_limit(est)),
        cost_estimate=pl.CostEstimate(
            flops=2 * n * n * f_mid + 2 * n * f_mid * f_out,
            transcendentals=0,
            bytes_accessed=(n * n * adj.dtype.itemsize
                            + n * f_mid * xw.dtype.itemsize
                            + f_mid * f_out * w2.dtype.itemsize
                            + n * f_out * o_isz)),
    )(adj, xw, b, w2)


# --------------------------------------------------------------------------
# Stage B2: OUT = adj @ HW2 + b2
#   HW2 is VMEM-resident; accumulation goes directly into the resident f32
#   output block (no extra scratch).
# --------------------------------------------------------------------------
def _agg2_kernel(adj_ref, hw_ref, b_ref, out_ref):
    k = pl.program_id(1)
    tk = adj_ref.shape[1]

    @pl.when(k == 0)
    def _():
        out_ref[...] = jnp.zeros_like(out_ref)

    start = pl.multiple_of(k * tk, tk)
    hw_k = hw_ref[pl.ds(start, tk), :]
    out_ref[...] += jnp.dot(adj_ref[...], hw_k,
                            preferred_element_type=jnp.float32)

    @pl.when(k == pl.num_programs(1) - 1)
    def _():
        out_ref[...] += b_ref[...].astype(jnp.float32)


def _aggregate2(adj, hw, b, tm, tk):
    n = adj.shape[0]
    f_out = hw.shape[1]
    est = (2 * tm * tk * adj.dtype.itemsize
           + 2 * n * f_out * hw.dtype.itemsize   # resident HW2 (budget 2x)
           + 2 * tm * f_out * 4)                 # resident f32 output block
    return pl.pallas_call(
        _agg2_kernel,
        out_shape=jax.ShapeDtypeStruct((n, f_out), jnp.float32),
        grid=(n // tm, n // tk),
        in_specs=[
            pl.BlockSpec((tm, tk), lambda i, k: (i, k)),      # adj tile (streamed)
            pl.BlockSpec((n, f_out), lambda i, k: (0, 0)),    # HW2 (VMEM resident)
            pl.BlockSpec((1, f_out), lambda i, k: (0, 0)),    # b2 (tiny, resident)
        ],
        out_specs=pl.BlockSpec((tm, f_out), lambda i, k: (i, 0)),
        compiler_params=pltpu.CompilerParams(
            dimension_semantics=("parallel", "arbitrary"),
            vmem_limit_bytes=_vmem_limit(est)),
        cost_estimate=pl.CostEstimate(
            flops=2 * n * n * f_out,
            transcendentals=0,
            bytes_accessed=(n * n * adj.dtype.itemsize
                            + n * f_out * hw.dtype.itemsize
                            + n * f_out * 4)),
    )(adj, hw, b)


# --------------------------------------------------------------------------
# Full forward
# --------------------------------------------------------------------------
def _pick_tiles(n, tile_rows, tile_cols):
    """Returns (n_pad, tm, tk) for the adj aggregation stages."""
    if n <= tile_cols:
        n_pad = _round_up(n, 8)
        return n_pad, n_pad, n_pad
    assert tile_rows % 128 == 0 and tile_cols % 128 == 0
    assert tile_cols % tile_rows == 0
    n_pad = _round_up(n, max(tile_rows, tile_cols))
    return n_pad, tile_rows, tile_cols


def prepare_adj(adj, n_pad, dtype=None):
    """Pad adj to (n_pad, n_pad) and optionally cast.

    Call once outside the hot path (adj is static per graph) so the forward
    pass does not rewrite an N^2 array in HBM on every call.
    """
    dt = dtype if dtype is not None else adj.dtype
    if adj.shape != (n_pad, n_pad):
        adj = jnp.pad(adj, ((0, n_pad - adj.shape[0]),
                            (0, n_pad - adj.shape[1])))
    return adj.astype(dt)


def gpn_encoder_forward(x, adj, w1, b1, w2, b2, *,
                        tile_rows=256, tile_cols=1024,
                        compute_dtype=jnp.bfloat16):
    """GPN_Encoder forward (eval mode).

    tile_rows/tile_cols: adj tile shape for N > tile_cols.  A wide reduction
        tile (tk=1024) gives long contiguous HBM bursts on the row-major adj.
    compute_dtype: MXU operand dtype for adj / XW1 / HW2 / W (accumulation is
        always f32).  bf16 (default) halves HBM traffic on the adj-streaming-
        bound aggregations; pass None to keep the input dtype exactly.
    adj may be pre-padded/cast via prepare_adj(adj, n_pad, dtype) to avoid a
        per-call N^2 pad/cast copy.
    """
    n, nfeat = x.shape
    f1 = w1.shape[1]            # 2 * nhid
    nhid = w2.shape[1]

    # Lane-dense (multiple-of-128) feature dims -> unmasked vst, full MXU cols.
    f1p = _round_up(f1, 128)
    f2p = _round_up(nhid, 128)
    if nfeat <= 1024:
        nfeat_p = _round_up(nfeat, 128)
        tka = nfeat_p
    else:                        # tile the stage-A reduction for large nfeat
        nfeat_p = _round_up(nfeat, 512)
        tka = 512

    n_pad, tm, tk = _pick_tiles(n, tile_rows, tile_cols)
    # Stage A row tile is decoupled (its blocks are tiny): bigger tile, fewer
    # grid steps.
    tma = 1024 if (n_pad >= 1024 and n_pad % 1024 == 0) else tm

    def pad2(a, r, c):
        if a.shape == (r, c):
            return a
        return jnp.pad(a, ((0, r - a.shape[0]), (0, c - a.shape[1])))

    # Zero padding is exact: padded adj rows/cols, x rows/cols and W/b entries
    # are zero, so padded lanes contribute nothing and are sliced off below.
    x_p = pad2(x, n_pad, nfeat_p)
    w1_p = pad2(w1.reshape(nfeat, f1), nfeat_p, f1p)
    b1_p = pad2(b1.reshape(1, -1), 1, f1p)
    w2_p = pad2(w2.reshape(f1, nhid), f1p, f2p)
    b2_p = pad2(b2.reshape(1, -1), 1, f2p)

    op_dtype = compute_dtype if compute_dtype is not None else x.dtype
    if compute_dtype is not None:
        x_p = x_p.astype(compute_dtype)
        w1_p = w1_p.astype(compute_dtype)
        w2_p = w2_p.astype(compute_dtype)

    # adj: skip the pad/cast copy when the caller already prepared it.
    if adj.shape == (n_pad, n_pad) and adj.dtype == jnp.dtype(op_dtype):
        adj_p = adj
    else:
        adj_p = prepare_adj(adj, n_pad, op_dtype)

    # Stage A: XW1 = X @ W1 (computed once, not per adj row tile).
    xw1 = _feature_transform(x_p, w1_p, op_dtype, tma, tka)

    # Stage B1: HW2 = relu(adj @ XW1 + b1) @ W2 (dropout identity in eval).
    hw2 = _aggregate1(adj_p, xw1, b1_p, w2_p, op_dtype, tm, tk)

    # Stage B2: OUT = adj @ HW2 + b2 (f32 output).
    out_p = _aggregate2(adj_p, hw2, b2_p, tm, tk)

    return out_p[:n, :nhid]


def reference_forward(x, adj, w1, b1, w2, b2):
    """Pure-JAX reference matching the PyTorch module (eval mode)."""
    h = jnp.maximum(adj @ (x @ w1) + b1, 0.0)
    return adj @ (h @ w2) + b2


if __name__ == "__main__":
    key = jax.random.PRNGKey(0)
    k_x, k_adj, k_w1, k_b1, k_w2, k_b2 = jax.random.split(key, 6)

    # Small, module-consistent shapes.
    N = 16          # number of graph nodes
    nfeat = 32      # input feature dim
    nhid = 32       # hidden dim -> gc1 output dim = 2*nhid = 64

    x = jax.random.normal(k_x, (N, nfeat), dtype=jnp.float32)

    # Symmetric row-normalized adjacency with self-loops (typical GCN input).
    a = jax.random.uniform(k_adj, (N, N), dtype=jnp.float32)
    a = (a + a.T) * 0.5 + jnp.eye(N, dtype=jnp.float32)
    adj = a / jnp.sum(a, axis=1, keepdims=True)

    # Deterministic parameter init (uniform, like GraphConvolution.reset_parameters).
    def uinit(k, shape, fan):
        bound = 1.0 / jnp.sqrt(fan)
        return jax.random.uniform(k, shape, jnp.float32, -bound, bound)

    w1 = uinit(k_w1, (nfeat, 2 * nhid), 2 * nhid)
    b1 = uinit(k_b1, (1, 2 * nhid), 2 * nhid)
    w2 = uinit(k_w2, (2 * nhid, nhid), nhid)
    b2 = uinit(k_b2, (1, nhid), nhid)

    ref = reference_forward(x, adj, w1, b1, w2, b2)

    # Exact-precision path (f32 operands) -> tight tolerance.
    out_f32 = gpn_encoder_forward(x, adj, w1, b1, w2, b2, compute_dtype=None)
    out_f32 = jax.block_until_ready(out_f32)
    assert out_f32.shape == (N, nhid)
    assert jnp.allclose(out_f32, ref, atol=1e-4, rtol=1e-4), "f32 mismatch vs reference"

    # Default (bf16 operands, f32 accumulation) path -> bf16-level tolerance.
    out_bf16 = gpn_encoder_forward(x, adj, w1, b1, w2, b2)  # compute_dtype=bf16
    out_bf16 = jax.block_until_ready(out_bf16)
    assert out_bf16.shape == (N, nhid)
    assert jnp.allclose(out_bf16, ref, atol=5e-2, rtol=5e-2), "bf16 mismatch vs reference"

    print("KERNEL_OK")
</pallas_src>

<mosaic_0001>
module attributes {stable_mosaic.version = 11 : i64} {
  func.func @_xw_kernel(%arg0: i32, %arg1: i32, %arg2: memref<16x128xf32, #tpu.memory_space<vmem>>, %arg3: memref<128x128xf32, #tpu.memory_space<vmem>>, %arg4: memref<16x128xf32, #tpu.memory_space<vmem>>, %arg5: memref<16x128xf32, #tpu.memory_space<vmem>>) attributes {dimension_semantics = [#tpu.dimension_semantics<parallel>, #tpu.dimension_semantics<arbitrary>], iteration_bounds = array<i64: 1, 1>, scalar_prefetch = 0 : i64, scratch_operands = 1 : i64, tpu.core_type = #tpu.core_type<tc>, window_params = [{transform_indices = @transform_0, window_bounds = array<i64: 16, 128>}, {transform_indices = @transform_1, window_bounds = array<i64: 128, 128>}, {transform_indices = @transform_2, window_bounds = array<i64: 16, 128>}]} {
    %c0_i32 = arith.constant 0 : i32
    %0 = arith.cmpi eq, %arg1, %c0_i32 : i32
    %1 = arith.extui %0 : i1 to i32
    %c0_i32_0 = arith.constant 0 : i32
    %2 = arith.cmpi ne, %1, %c0_i32_0 : i32
    scf.if %2 {
      %cst_10 = arith.constant 0.000000e+00 : f32
      %12 = vector.broadcast %cst_10 : f32 to vector<16x128xf32>
      %c0_11 = arith.constant 0 : index
      %c0_12 = arith.constant 0 : index
      %13 = vector.load %arg5[%c0_11, %c0_12] : memref<16x128xf32, #tpu.memory_space<vmem>>, vector<16x128xf32>
      tpu.vector_store %arg5[%c0_11, %c0_12], %12 {strides = array<i32>} : memref<16x128xf32, #tpu.memory_space<vmem>>, vector<16x128xf32>,
    } else {
    }
    %c0 = arith.constant 0 : index
    %c0_1 = arith.constant 0 : index
    %3 = vector.load %arg5[%c0, %c0_1] : memref<16x128xf32, #tpu.memory_space<vmem>>, vector<16x128xf32>
    %c0_2 = arith.constant 0 : index
    %c0_3 = arith.constant 0 : index
    %4 = vector.load %arg2[%c0_2, %c0_3] : memref<16x128xf32, #tpu.memory_space<vmem>>, vector<16x128xf32>
    %c0_4 = arith.constant 0 : index
    %c0_5 = arith.constant 0 : index
    %5 = vector.load %arg3[%c0_4, %c0_5] : memref<128x128xf32, #tpu.memory_space<vmem>>, vector<128x128xf32>
    %cst = arith.constant dense<0.000000e+00> : vector<16x128xf32>
    %6 = tpu.matmul %4, %5, %cst {dimension_numbers = #tpu.dot_dimension_numbers<[1], [0], [0], [1], [0, 0, 1, 1], [], []>} : vector<16x128xf32>, vector<128x128xf32>, vector<16x128xf32> -> vector<16x128xf32>
    %7 = arith.addf %3, %6 : vector<16x128xf32>
    %c0_6 = arith.constant 0 : index
    %c0_7 = arith.constant 0 : index
    %8 = vector.load %arg5[%c0_6, %c0_7] : memref<16x128xf32, #tpu.memory_space<vmem>>, vector<16x128xf32>
    tpu.vector_store %arg5[%c0_6, %c0_7], %7 {strides = array<i32>} : memref<16x128xf32, #tpu.memory_space<vmem>>, vector<16x128xf32>,
    %c0_i32_8 = arith.constant 0 : i32
    %9 = arith.cmpi eq, %arg1, %c0_i32_8 : i32
    %10 = arith.extui %9 : i1 to i32
    %c0_i32_9 = arith.constant 0 : i32
    %11 = arith.cmpi ne, %10, %c0_i32_9 : i32
    scf.if %11 {
      %c0_10 = arith.constant 0 : index
      %c0_11 = arith.constant 0 : index
      %12 = vector.load %arg5[%c0_10, %c0_11] : memref<16x128xf32, #tpu.memory_space<vmem>>, vector<16x128xf32>
      %c0_12 = arith.constant 0 : index
      %c0_13 = arith.constant 0 : index
      %13 = vector.load %arg4[%c0_12, %c0_13] : memref<16x128xf32, #tpu.memory_space<vmem>>, vector<16x128xf32>
      tpu.vector_store %arg4[%c0_12, %c0_13], %12 {strides = array<i32>} : memref<16x128xf32, #tpu.memory_space<vmem>>, vector<16x128xf32>,
    } else {
    }
    return
  }
  func.func @transform_0(%arg0: i32, %arg1: i32) -> (i32, i32) {
    %c0_i32 = arith.constant 0 : i32
    return %arg0, %arg1 : i32, i32
  }
  func.func @transform_1(%arg0: i32, %arg1: i32) -> (i32, i32) {
    %c0_i32 = arith.constant 0 : i32
    %c0_i32_0 = arith.constant 0 : i32
    return %arg1, %c0_i32 : i32, i32
  }
  func.func @transform_2(%arg0: i32, %arg1: i32) -> (i32, i32) {
    %c0_i32 = arith.constant 0 : i32
    %c0_i32_0 = arith.constant 0 : i32
    return %arg0, %c0_i32 : i32, i32
  }
}

</mosaic_0001>

<bundles_post_ra>
// kernel: tpu_custom_call.1
= control target key start
LH: loop header
LB: loop body
LE: loop exit
PB: predicated region body
PF: predicated region fallthrough
CT: control target
= control target key end

     0   :  { %7 = vsyncpa [#allocation4], 0  ;;  %s397_s0 = inlined_call_operand.hbm [shape: f32[16,128], index: 0, kind: input, shape index: {}]   ;;  %s398_s1 = inlined_call_operand.hbm [shape: f32[128,128], index: 1, kind: input, shape index: {}]   ;;  %s399_s2 = inlined_call_operand.hbm [shape: f32[16,128], index: 2, kind: output, shape index: {}]  }
   0x1   :  { %8 = vsyncpa [#allocation7], 0 }
   0x2   :  { %9 = vsyncpa [#allocation5], 0  ;;  %s332_s9 = smov [#allocation3]   ;;  %s260_s13 = scalar_lea.hbm %s397_s0, 256 }
   0x3   :  { %s15_s10 = sshll.u32 %s332_s9, 4  ;;  %p261_p0 = scmp.ne.s32.totalorder %s397_s0, %s260_s13  ;;  %s16_s10 = int_to_ptr.vmem [resolvable:$true] %s15_s10 }
   0x4   :  { %p264_p1 = scmp.lt.u32.totalorder %s260_s13, %s397_s0 }
   0x6   :  { %p266_p2 = pnand %p264_p1, %p261_p0 }
   0x8   :  { %269 = shalt.err (!%p266_p2)
}
   0x9   :  { %s270_s18 = scalar_lea.vmem %s16_s10, 256  ;;  %p275_p4 = scmp.lt.s32.totalorder %s16_s10, %s16_s10 }
   0xa   :  { %p271_p3 = scmp.ne.s32.totalorder %s16_s10, %s270_s18  ;;  %p276_p5 = scmp.lt.s32.totalorder %s270_s18, %s270_s18 }
   0xc   :  { %p277_p6 = por %p276_p5, %p275_p4 }
   0xe   :  { %p278_p7 = pnand %p277_p6, %p271_p3 }
  0x10   :  { %281 = shalt.err (!%p278_p7)
}
  0x11   :  { %s333_s19 = smov 128   ;;  %s334_s20 = smov 8  }
  0x12   :  { %21 = dma.hbm_to_vmem [thread:$0]  %s397_s0, 256, %s16_s10, [#allocation4], %s333_s19, %s333_s19, %s334_s20  }
  0x13   :  { %s335_s23 = smov [#allocation6]   ;;  %s282_s27 = scalar_lea.hbm %s398_s1, 2048 }
  0x14   :  { %s27_s24 = sshll.u32 %s335_s23, 4  ;;  %p283_p8 = scmp.ne.s32.totalorder %s398_s1, %s282_s27  ;;  %s28_s24 = int_to_ptr.vmem [resolvable:$true] %s27_s24 }
  0x15   :  { %p286_p9 = scmp.lt.u32.totalorder %s282_s27, %s398_s1 }
  0x17   :  { %p288_p10 = pnand %p286_p9, %p283_p8 }
  0x19   :  { %291 = shalt.err (!%p288_p10)
}
  0x1a   :  { %s292_s4 = scalar_lea.vmem %s28_s24, 2048  ;;  %p297_p12 = scmp.lt.s32.totalorder %s28_s24, %s28_s24 }
  0x1b   :  { %p293_p11 = scmp.ne.s32.totalorder %s28_s24, %s292_s4  ;;  %p298_p13 = scmp.lt.s32.totalorder %s292_s4, %s292_s4 }
  0x1d   :  { %p299_p0 = por %p298_p13, %p297_p12 }
  0x1f   :  { %p300_p1 = pnand %p299_p0, %p293_p11 }
  0x21   :  { %303 = shalt.err (!%p300_p1)
}
  0x22   :  { %33 = dma.hbm_to_vmem [thread:$0]  %s398_s1, 2048, %s28_s24, [#allocation7], %s333_s19, %s333_s19, %s334_s20  }
  0x23   :  { %326 = dma.done.wait [#allocation4], 256  }
  0x24   :  { %327 = vsyncadd [#allocation4], 4294967040 }
  0x25   :  { %328 = dma.done.wait [#allocation7], 2048  }
  0x26   :  { %329 = vsyncadd [#allocation7], 4294965248  ;;  %v50_v0 = vld [vmem:[#allocation6] sm:$0xff]  ;;  %v51_v1 = vld [vmem:[#allocation6 + $0x8] sm:$0xff]  ;;  %s336_s1 = smov [#allocation8]  }
  0x27   :  { %v52_v2 = vld [vmem:[#allocation6 + $0x10] sm:$0xff]  ;;  %v223_v3 = vpack.c.bf16 %v51_v1, %v50_v0  ;;  %v53_v4 = vld [vmem:[#allocation6 + $0x18] sm:$0xff]  ;;  %v54_v6 = vld [vmem:[#allocation6 + $0x20] sm:$0xff]  ;;  %s157_s6 = sshll.u32 %s336_s1, 4  ;;  %s158_s6 = int_to_ptr.vmem [resolvable:$true] %s157_s6 }
  0x28   :  { %v227_v5 = vpack.c.bf16 %v53_v4, %v52_v2  ;;  %v55_v7 = vld [vmem:[#allocation6 + $0x28] sm:$0xff]  ;;  %v48_v9 = vld [vmem:[#allocation3] sm:$0xff]  ;;  %v57_v11 = vld [vmem:[#allocation6 + $0x38] sm:$0xff]  ;;  %s304_s7 = scalar_lea.vmem %s158_s6, 256  ;;  %p309_p3 = scmp.lt.s32.totalorder %s158_s6, %s158_s6 }
  0x29   :  { %224 = vmatprep.subr.bf16.mxu0 %v223_v3  ;;  %v231_v8 = vpack.c.bf16 %v55_v7, %v54_v6  ;;  %v56_v10 = vld [vmem:[#allocation6 + $0x30] sm:$0xff]  ;;  %220 = vmatprep.mubr.f32.mxu0 %v48_v9  ;;  %v58_v13 = vld [vmem:[#allocation6 + $0x40] sm:$0xff]  ;;  %v59_v14 = vld [vmem:[#allocation6 + $0x48] sm:$0xff]  ;;  %p305_p2 = scmp.ne.s32.totalorder %s158_s6, %s304_s7  ;;  %p310_p4 = scmp.lt.s32.totalorder %s304_s7, %s304_s7 }
  0x2a   :  { %226 = vmatpush3.bf16.msra.mxu0 %v223_v3  ;;  %v235_v12 = vpack.c.bf16 %v57_v11, %v56_v10  ;;  %v239_v15 = vpack.c.bf16 %v59_v14, %v58_v13  ;;  %v60_v16 = vld [vmem:[#allocation6 + $0x50] sm:$0xff]  ;;  %v61_v17 = vld [vmem:[#allocation6 + $0x58] sm:$0xff]  ;;  %v62_v19 = vld [vmem:[#allocation6 + $0x60] sm:$0xff] }
  0x2b   :  { %228 = vmatprep.subr.bf16.mxu0 %v227_v5  ;;  %v243_v18 = vpack.c.bf16 %v61_v17, %v60_v16  ;;  %v63_v20 = vld [vmem:[#allocation6 + $0x68] sm:$0xff]  ;;  %v64_v22 = vld [vmem:[#allocation6 + $0x70] sm:$0xff]  ;;  %v65_v23 = vld [vmem:[#allocation6 + $0x78] sm:$0xff]  ;;  %p311_p5 = por %p310_p4, %p309_p3 }
  0x2c   :  { %v247_v21 = vpack.c.bf16 %v63_v20, %v62_v19  ;;  %v251_v24 = vpack.c.bf16 %v65_v23, %v64_v22  ;;  %v49_v25 = vld [vmem:[#allocation3 + $0x8] sm:$0xff] }
  0x2d   :  { %p312_p6 = pnand %p311_p5, %p305_p2 }
  0x2e   :  { %230 = vmatpush3.bf16.msra.mxu0 %v227_v5 }
  0x2f   :  { %232 = vmatprep.subr.bf16.mxu0 %v231_v8 }
  0x32   :  { %234 = vmatpush3.bf16.msra.mxu0 %v231_v8 }
  0x33   :  { %236 = vmatprep.subr.bf16.mxu0 %v235_v12 }
  0x36   :  { %238 = vmatpush3.bf16.msra.mxu0 %v235_v12 }
  0x37   :  { %240 = vmatprep.subr.bf16.mxu0 %v239_v15 }
  0x3a   :  { %242 = vmatpush3.bf16.msra.mxu0 %v239_v15 }
  0x3b   :  { %244 = vmatprep.subr.bf16.mxu0 %v243_v18 }
  0x3e   :  { %246 = vmatpush3.bf16.msra.mxu0 %v243_v18 }
  0x3f   :  { %248 = vmatprep.subr.bf16.mxu0 %v247_v21 }
  0x42   :  { %250 = vmatpush3.bf16.msra.mxu0 %v247_v21 }
  0x43   :  { %252 = vmatprep.subr.bf16.mxu0 %v251_v24 }
  0x46   :  { %254 = vmatpush3.bf16.msra.mxu0 %v251_v24 }
  0x49   :  { %221 = vmatmul.mubr.f32.vlgmr.msra.gmra.mrb[0].mxu0 %v49_v25 }
 0x11c   :  { %v222_v26 = vpop.f32.mrb[0].mxu0 }
 0x11d   :  { %151 = vst [vmem:[#allocation8 + $0x8] sm:$0xff] %v222_v26  ;;  %v132_v27 = vpop.f32.mrb[1].mxu0 }
 0x11e   :  { %150 = vst [vmem:[#allocation8] sm:$0xff] %v132_v27 }
 0x11f   :  { %315 = shalt.err (!%p312_p6)
}
 0x120   :  { %s316_s10 = scalar_lea.hbm %s399_s2, 256 }
 0x121   :  { %p317_p7 = scmp.ne.s32.totalorder %s399_s2, %s316_s10  ;;  %p320_p8 = scmp.lt.u32.totalorder %s316_s10, %s399_s2 }
 0x123   :  { %p322_p9 = pnand %p320_p8, %p317_p7 }
 0x125   :  { %325 = shalt.err (!%p322_p9)
}
 0x126   :  { %163 = dma.vmem_to_hbm [thread:$0]  %s158_s6, 256, %s399_s2, [#allocation5], %s333_s19, %s333_s19, %s334_s20  }
 0x127   :  { %330 = dma.done.wait [#allocation5], 256  }
 0x128   :  { %331 = vsyncadd [#allocation5], 4294967040 }
 0x129   :  { %167 = vsyncpa [#allocation4], 1 }
 0x12a   :  { %168 = vsyncpa [#allocation7], 1 }
 0x12b   :  { %169 = vsyncpa [#allocation5], 1 }

</bundles_post_ra>
